<compile_context>
chip_gen: v7x
topology: tpu7x:2x2x1
jax: 0.10.0
libtpu: 0.0.40
codegen_flags: <defaults>
</compile_context>

<pallas_src>
import jax
import jax.numpy as jnp
from jax.experimental import pallas as pl
from jax.experimental.pallas import tpu as pltpu


def _locked_dropout_kernel(mask_ref, x_ref, o_ref):
    """mask_ref: VMEM (1, BH); x_ref / o_ref: VMEM (TT, BH).

    The (1, BH) mask broadcasts over the sublane (T-tile) axis; one VPU
    multiply per element, no dtype widening.
    """
    o_ref[...] = x_ref[...] * mask_ref[...]


def _vmem_capacity_bytes():
    """Physical VMEM of the local chip; conservative 64 MiB (v7x) fallback."""
    try:
        cap = getattr(pltpu.get_tpu_info(), "vmem_capacity_bytes", None)
        if cap:
            return int(cap)
    except Exception:
        pass
    return 64 << 20


def _choose_t_tile(T, bh, itemsize):
    """Pick a T-tile (multiple of 8 sublanes) and a scoped-VMEM limit.

    * Budget 2 double-buffered x tiles + 2 out tiles + mask into ~3/4 of this
      chip's physical VMEM, capped at 12 MiB per tile (safe on v7x's 64 MiB).
    * Keep >= 2 grid steps on big arrays so the "parallel" axis can shard
      across both TensorCores on v7x.
    * Prefer a tile that divides T so the last step isn't a masked epilogue.

    Returns (tt, vmem_limit_bytes, fits_vmem).
    """
    row_bytes = max(bh * itemsize, 1)
    vmem_phys = _vmem_capacity_bytes()
    per_tile_cap = min((vmem_phys * 3 // 4) // 4, 12 << 20)

    tt = (per_tile_cap // row_bytes) // 8 * 8
    tt = max(tt, 8)

    total_bytes = T * row_bytes
    if tt >= T:
        if T >= 16 and total_bytes >= (2 << 20):
            # Big enough to care about bandwidth: split into >= 2 steps so
            # both TensorCores stream on v7x (no-op on 1-TC v5e/v6e).
            tt = (((T + 1) // 2) + 7) // 8 * 8
        else:
            tt = T

    if tt < T:
        # Prefer a multiple-of-8 divisor of T within ~25% of the target so
        # every step's DMA is full-sized (no masked last tile).
        lo = max(((tt * 3) // 4) // 8 * 8, 8)
        for cand in range(tt, lo - 1, -8):
            if T % cand == 0:
                tt = cand
                break

    tile_bytes = tt * row_bytes
    pipeline_bytes = 4 * tile_bytes + 2 * row_bytes  # 2x in, 2x out, 2x mask
    vmem_limit = max(pipeline_bytes + (4 << 20), 32 << 20)
    vmem_limit = min(vmem_limit, vmem_phys - (8 << 20))
    fits = (pipeline_bytes + (2 << 20)) <= (vmem_phys - (8 << 20))
    return tt, int(vmem_limit), fits


def locked_dropout(x, key, dropout=0.5, training=True, donate_input=False):
    """Forward pass of LockedDropout.

    x: (T, B, H) array. Returns x unchanged if not training or dropout == 0,
    otherwise mask * x with a per-(B, H) mask shared across T.
    """
    if (not training) or (not dropout):
        return x

    T, B, H = x.shape
    BH = B * H
    keep_prob = 1.0 - float(dropout)

    # One mask for the whole sequence, built once in the wrapper (tiny).
    keep = jax.random.bernoulli(key, p=keep_prob, shape=(1, B, H))
    mask3 = (keep.astype(jnp.float32) * (1.0 / keep_prob)).astype(x.dtype)

    itemsize = x.dtype.itemsize
    tt, vmem_limit, fits = _choose_t_tile(T, BH, itemsize)

    # Narrow / non-lane-aligned hidden (masked vst.msk partial stores) or a
    # row too wide for the VMEM budget -> plain fused XLA multiply instead.
    if BH < 128 or BH % 128 != 0 or not fits:
        return x * mask3

    # Lane-dense layout: (T, B*H) so the last dim maps onto full 128-lane
    # vregs (unmasked vst for BH a multiple of 128).
    mask = mask3.reshape(1, BH)
    x2 = x.reshape(T, BH)

    grid = (pl.cdiv(T, tt),)

    cost = pl.CostEstimate(
        flops=T * BH,
        transcendentals=0,
        bytes_accessed=2 * T * BH * itemsize + BH * itemsize,
    )

    out = pl.pallas_call(
        _locked_dropout_kernel,
        out_shape=jax.ShapeDtypeStruct((T, BH), x.dtype),
        grid=grid,
        in_specs=[
            pl.BlockSpec((1, BH), lambda t: (0, 0)),    # mask: same block each step
            pl.BlockSpec((tt, BH), lambda t: (t, 0)),   # x tile along T
        ],
        out_specs=pl.BlockSpec((tt, BH), lambda t: (t, 0)),
        compiler_params=pltpu.CompilerParams(
            dimension_semantics=("parallel",),
            vmem_limit_bytes=vmem_limit,
        ),
        cost_estimate=cost,
        input_output_aliases={1: 0} if donate_input else {},
    )(mask, x2)

    return out.reshape(T, B, H)


if __name__ == "__main__":
    key = jax.random.PRNGKey(0)
    data_key, mask_key = jax.random.split(key)

    dropout = 0.5
    scale = 1.0 / (1.0 - dropout)

    # Lane-dense case (B*H = 256, multiple of 128): exercises the Pallas kernel.
    T, B, H = 8, 2, 128
    x = jax.random.normal(data_key, (T, B, H), dtype=jnp.float32)
    out = jax.block_until_ready(
        locked_dropout(x, mask_key, dropout=dropout, training=True))

    # Sanity checks: same shape/dtype; mask values in {0, 1/(1-p)}; mask is
    # identical ("locked") across the time axis.
    assert out.shape == x.shape and out.dtype == x.dtype
    ratio = out / x                                   # x ~ N(0,1), never exactly 0
    is_zero = jnp.abs(ratio) < 1e-5
    is_scale = jnp.abs(ratio - scale) < 1e-5
    assert bool(jnp.all(is_zero | is_scale)), "mask values not in {0, 1/(1-p)}"
    assert bool(jnp.all(jnp.abs(ratio - ratio[0:1]) < 1e-5)), "mask not locked over T"

    # Narrow-hidden case (B*H = 64 < 128): goes through the plain-JAX fallback.
    xs = jax.random.normal(data_key, (8, 2, 32), dtype=jnp.float32)
    outs = jax.block_until_ready(
        locked_dropout(xs, mask_key, dropout=dropout, training=True))
    ratios = outs / xs
    assert bool(jnp.all((jnp.abs(ratios) < 1e-5) | (jnp.abs(ratios - scale) < 1e-5)))
    assert bool(jnp.all(jnp.abs(ratios - ratios[0:1]) < 1e-5))

    # Eval / no-dropout paths return the input unchanged.
    assert bool(jnp.all(locked_dropout(x, mask_key, dropout=dropout, training=False) == x))
    assert bool(jnp.all(locked_dropout(x, mask_key, dropout=0.0, training=True) == x))

    print("KERNEL_OK")
</pallas_src>

<mosaic_0001>
module attributes {stable_mosaic.version = 11 : i64} {
  func.func @_locked_dropout_kernel(%arg0: i32, %arg1: memref<1x256xf32, #tpu.memory_space<vmem>>, %arg2: memref<8x256xf32, #tpu.memory_space<vmem>>, %arg3: memref<8x256xf32, #tpu.memory_space<vmem>>) attributes {dimension_semantics = [#tpu.dimension_semantics<parallel>], iteration_bounds = array<i64: 1>, scalar_prefetch = 0 : i64, scratch_operands = 0 : i64, tpu.core_type = #tpu.core_type<tc>, window_params = [{pipeline_mode = #tpu.pipeline_mode<synchronous>, transform_indices = @transform_0, window_bounds = array<i64: 1, 256>}, {transform_indices = @transform_1, window_bounds = array<i64: 8, 256>}, {transform_indices = @transform_2, window_bounds = array<i64: 8, 256>}]} {
    %c0 = arith.constant 0 : index
    %c0_0 = arith.constant 0 : index
    %0 = vector.load %arg2[%c0, %c0_0] : memref<8x256xf32, #tpu.memory_space<vmem>>, vector<8x256xf32>
    %c0_1 = arith.constant 0 : index
    %c0_2 = arith.constant 0 : index
    %1 = vector.load %arg1[%c0_1, %c0_2] : memref<1x256xf32, #tpu.memory_space<vmem>>, vector<1x256xf32>
    %2 = vector.broadcast %1 : vector<1x256xf32> to vector<8x256xf32>
    %3 = arith.mulf %0, %2 : vector<8x256xf32>
    %c0_3 = arith.constant 0 : index
    %c0_4 = arith.constant 0 : index
    %4 = vector.load %arg3[%c0_3, %c0_4] : memref<8x256xf32, #tpu.memory_space<vmem>>, vector<8x256xf32>
    tpu.vector_store %arg3[%c0_3, %c0_4], %3 {strides = array<i32>} : memref<8x256xf32, #tpu.memory_space<vmem>>, vector<8x256xf32>,
    return
  }
  func.func @transform_0(%arg0: i32) -> (i32, i32) {
    %c0_i32 = arith.constant 0 : i32
    %c0_i32_0 = arith.constant 0 : i32
    %c0_i32_1 = arith.constant 0 : i32
    return %c0_i32, %c0_i32_0 : i32, i32
  }
  func.func @transform_1(%arg0: i32) -> (i32, i32) {
    %c0_i32 = arith.constant 0 : i32
    %c0_i32_0 = arith.constant 0 : i32
    return %arg0, %c0_i32 : i32, i32
  }
  func.func @transform_2(%arg0: i32) -> (i32, i32) {
    %c0_i32 = arith.constant 0 : i32
    %c0_i32_0 = arith.constant 0 : i32
    return %arg0, %c0_i32 : i32, i32
  }
}

</mosaic_0001>

<bundles_post_ra>
// kernel: tpu_custom_call.1
= control target key start
LH: loop header
LB: loop body
LE: loop exit
PB: predicated region body
PF: predicated region fallthrough
CT: control target
= control target key end

     0   :  { %7 = vsyncpa [#allocation3], 0  ;;  %s199_s0 = inlined_call_operand.hbm [shape: f32[1,256], index: 0, kind: input, shape index: {}]   ;;  %s200_s1 = inlined_call_operand.hbm [shape: f32[8,256], index: 1, kind: input, shape index: {}]   ;;  %s201_s2 = inlined_call_operand.hbm [shape: f32[8,256], index: 2, kind: output, shape index: {}]  }
   0x1   :  { %8 = vsyncpa [#allocation6], 0 }
   0x2   :  { %9 = vsyncpa [#allocation4], 0  ;;  %s145_s9 = smov [#allocation2]   ;;  %s146_s11 = smov [#allocation5]  }
   0x3   :  { %s16_s10 = sshll.u32 %s145_s9, 4  ;;  %s26_s12 = sshll.u32 %s146_s11, 4  ;;  %s17_s10 = int_to_ptr.vmem [resolvable:$true] %s16_s10  ;;  %s27_s12 = int_to_ptr.vmem [resolvable:$true] %s26_s12 }
   0x4   :  { %s73_s15 = scalar_lea.hbm %s199_s0, 32 }
   0x5   :  { %p74_p0 = scmp.ne.s32.totalorder %s199_s0, %s73_s15  ;;  %p77_p1 = scmp.lt.u32.totalorder %s73_s15, %s199_s0 }
   0x7   :  { %p79_p2 = pnand %p77_p1, %p74_p0 }
   0x9   :  { %82 = shalt.err (!%p79_p2)
}
   0xa   :  { %s83_s20 = scalar_lea.vmem %s17_s10, 32  ;;  %p88_p4 = scmp.lt.s32.totalorder %s17_s10, %s17_s10 }
   0xb   :  { %p84_p3 = scmp.ne.s32.totalorder %s17_s10, %s83_s20  ;;  %p89_p5 = scmp.lt.s32.totalorder %s83_s20, %s83_s20 }
   0xd   :  { %p90_p6 = por %p89_p5, %p88_p4 }
   0xf   :  { %p91_p7 = pnand %p90_p6, %p84_p3 }
  0x11   :  { %94 = shalt.err (!%p91_p7)
}
  0x12   :  { %19 = dma.hbm_to_vmem [thread:$0]  %s199_s0, 32, %s17_s10, [#allocation3]  }
  0x13   :  { %s95_s25 = scalar_lea.hbm %s200_s1, 256 }
  0x14   :  { %p96_p8 = scmp.ne.s32.totalorder %s200_s1, %s95_s25  ;;  %p99_p9 = scmp.lt.u32.totalorder %s95_s25, %s200_s1 }
  0x16   :  { %p101_p10 = pnand %p99_p9, %p96_p8 }
  0x18   :  { %104 = shalt.err (!%p101_p10)
}
  0x19   :  { %s105_s30 = scalar_lea.vmem %s27_s12, 256  ;;  %p110_p12 = scmp.lt.s32.totalorder %s27_s12, %s27_s12 }
  0x1a   :  { %p106_p11 = scmp.ne.s32.totalorder %s27_s12, %s105_s30  ;;  %p111_p13 = scmp.lt.s32.totalorder %s105_s30, %s105_s30 }
  0x1c   :  { %p112_p0 = por %p111_p13, %p110_p12 }
  0x1e   :  { %p113_p1 = pnand %p112_p0, %p106_p11 }
  0x20   :  { %116 = shalt.err (!%p113_p1)
}
  0x21   :  { %29 = dma.hbm_to_vmem [thread:$0]  %s200_s1, 256, %s27_s12, [#allocation6]  }
  0x22   :  { %139 = dma.done.wait [#allocation3], 32  }
  0x23   :  { %140 = vsyncadd [#allocation3], 4294967264 }
  0x24   :  { %141 = dma.done.wait [#allocation6], 256  }
  0x25   :  { %142 = vsyncadd [#allocation6], 4294967040  ;;  %v40_v0 = vlaneseq  ;;  %v36_v4 = vld [vmem:[#allocation5] sm:$0xff]  ;;  %v38_v5 = vld [vmem:[#allocation2] sm:$0x3]  ;;  %s147_s4 = smov [#allocation7]  }
  0x26   :  { %v37_v6 = vld [vmem:[#allocation5 + $0x8] sm:$0xff]  ;;  %s60_s5 = sshll.u32 %s147_s4, 4  ;;  %s61_s5 = int_to_ptr.vmem [resolvable:$true] %s60_s5 }
  0x27   :  { %v41_v1 = vshrl.u32 %v40_v0, 7  ;;  %s117_s1 = scalar_lea.vmem %s61_s5, 256  ;;  %p122_p3 = scmp.lt.s32.totalorder %s61_s5, %s61_s5 }
  0x28   :  { %p118_p2 = scmp.ne.s32.totalorder %s61_s5, %s117_s1  ;;  %p123_p4 = scmp.lt.s32.totalorder %s117_s1, %s117_s1 }
  0x29   :  { %v42_v2 = vsub.s32 0, %v41_v1  ;;  %v46_v3 = vsub.s32 1, %v41_v1 }
  0x2a   :  { %p124_p5 = por %p123_p4, %p122_p3 }
  0x2b   :  { %v43_v7 = vrot.slane %v38_v5, %v42_v2  ;;  %v47_v8 = vrot.slane %v38_v5, %v46_v3 }
  0x2c   :  { %p125_p6 = pnand %p124_p5, %p118_p2 }
  0x2d   :  { %v50_v9 = vmul.f32 %v43_v7, %v36_v4  ;;  %v51_v10 = vmul.f32 %v47_v8, %v37_v6 }
  0x2f   :  { %52 = vst [vmem:[#allocation7] sm:$0xff] %v50_v9  ;;  %53 = vst [vmem:[#allocation7 + $0x8] sm:$0xff] %v51_v10 }
  0x30   :  { %128 = shalt.err (!%p125_p6)
}
  0x31   :  { %s129_s8 = scalar_lea.hbm %s201_s2, 256 }
  0x32   :  { %p130_p7 = scmp.ne.s32.totalorder %s201_s2, %s129_s8  ;;  %p133_p8 = scmp.lt.u32.totalorder %s129_s8, %s201_s2 }
  0x34   :  { %p135_p9 = pnand %p133_p8, %p130_p7 }
  0x36   :  { %138 = shalt.err (!%p135_p9)
}
  0x37   :  { %63 = dma.vmem_to_hbm [thread:$0]  %s61_s5, 256, %s201_s2, [#allocation4]  }
  0x38   :  { %143 = dma.done.wait [#allocation4], 256  }
  0x39   :  { %144 = vsyncadd [#allocation4], 4294967040 }
  0x3a   :  { %67 = vsyncpa [#allocation3], 1 }
  0x3b   :  { %68 = vsyncpa [#allocation6], 1 }
  0x3c   :  { %69 = vsyncpa [#allocation4], 1 }

</bundles_post_ra>
